<compile_context>
chip_gen: v5e
topology: v5e:2x2
jax: 0.10.0
libtpu: 0.0.40
codegen_flags: <defaults>
</compile_context>

<pallas_src>
import functools
from functools import partial

import jax
import jax.numpy as jnp
from jax.experimental import pallas as pl
from jax.experimental.pallas import tpu as pltpu


_LANE = 128     # lane width: feature dims (n_d / n_m / hidden) padded to this
_SUBLANE = 16   # bf16 sublane pack: row dims padded to a multiple of this


# ----------------------------- Pallas kernel ------------------------------
def _gnnp_kernel(y_ref, g_ref, w1_ref, w2_ref, res_ref, z_ref, *, bpp):
    """Fused 2-layer GCN.  Handles `bpp` branches per grid step (static unroll).

    Shapes (bf16 inputs, f32 outputs), R = padded row count:
      y_ref  : (bpp, R, 128)     padded Y   (branch 0: y0, branch 1: y0.T)
      g_ref  : (bpp, R, R)       padded graph
      w1_ref : (bpp, 128, 128)   padded layer-1 weight
      w2_ref : (bpp, 128, 128)   padded layer-2 weight
      res_ref: (bpp, R, 128)     G @ (z @ W2)
      z_ref  : (bpp, R, 128)     relu(G @ (Y @ W1))
    """
    for j in range(bpp):                       # static unroll (bpp in {1, 2})
        y = y_ref[j]                           # (R, 128)   bf16
        g = g_ref[j]                           # (R, R)     bf16
        w1 = w1_ref[j]                         # (128, 128) bf16
        w2 = w2_ref[j]                         # (128, 128) bf16

        # layer 1: feature transform first (small intermediate), then aggregate
        h = jnp.dot(y, w1, preferred_element_type=jnp.float32).astype(jnp.bfloat16)
        h = jnp.dot(g, h, preferred_element_type=jnp.float32)
        z = jnp.maximum(h, 0.0)                # relu hidden (VPU), f32
        z_ref[j] = z

        # layer 2
        r = jnp.dot(z.astype(jnp.bfloat16), w2,
                    preferred_element_type=jnp.float32).astype(jnp.bfloat16)
        res_ref[j] = jnp.dot(g, r, preferred_element_type=jnp.float32)


# ------------------------------ wrapper ------------------------------------
def _round_up(n, m):
    return ((n + m - 1) // m) * m


def _pad_to(x, rows, cols):
    """Cast to bf16 and zero-pad a 2-D array up to (rows, cols)."""
    x = x.astype(jnp.bfloat16)
    return jnp.pad(x, ((0, rows - x.shape[0]), (0, cols - x.shape[1])))


def _branches_per_program():
    """1 branch per grid step on v7x (2 TCs, 'parallel' grid); both branches in
    one step on single-TC v5e/v6e (avoids per-step pipeline overhead)."""
    try:
        kind = jax.devices()[0].device_kind.lower()
    except Exception:
        return 2
    return 1 if ("v7" in kind or "7x" in kind) else 2


def gnnp_prepare(params, gm, gd):
    """Pad + stack the static per-branch operands ONCE (outside the hot path)."""
    n_m = gm.shape[0]
    n_d = gd.shape[0]
    hidden = params["pl_w1"].shape[1]
    assert max(n_m, n_d, hidden) <= _LANE, "toy-size path: feature dims fit one lane block"
    R = _round_up(max(n_m, n_d), _SUBLANE)

    g_st = jnp.stack([_pad_to(gm, R, R), _pad_to(gd, R, R)])
    w1_st = jnp.stack([_pad_to(params["pl_w1"], _LANE, _LANE),
                       _pad_to(params["pd_w1"], _LANE, _LANE)])
    w2_st = jnp.stack([_pad_to(params["pl_w2"], _LANE, _LANE),
                       _pad_to(params["pd_w2"], _LANE, _LANE)])
    return g_st, w1_st, w2_st


@partial(jax.jit, static_argnames=("hidden",))
def gnnp_forward(g_st, w1_st, w2_st, y0, *, hidden):
    """yl, zl = LP_l(gm, y0);  yd, zd = LP_d(gd, y0.T) — one fused pallas_call."""
    n_m, n_d = y0.shape
    R = g_st.shape[1]

    # Per-branch Y input: branch 0 sees y0, branch 1 sees y0.T (stacked here so
    # the kernel does no transpose / mask-select work).
    y_st = jnp.stack([_pad_to(y0, R, _LANE), _pad_to(y0.T, R, _LANE)])

    bpp = _branches_per_program()          # branches per grid step (1 or 2)
    grid = (2 // bpp,)

    def per_branch(i):
        return (i, 0, 0)

    # real (unpadded) matmul flops: Y@W1, G@h, z@W2, G@r per branch
    def branch_flops(rows, feat, hid):
        return (2 * rows * feat * hid + 2 * rows * rows * hid
                + 2 * rows * hid * feat + 2 * rows * rows * feat)

    flops = branch_flops(n_m, n_d, hidden) + branch_flops(n_d, n_m, hidden)
    bytes_accessed = (2 * (y_st.size + g_st.size + w1_st.size + w2_st.size)
                      + 4 * (2 * 2 * R * _LANE))

    res, z = pl.pallas_call(
        functools.partial(_gnnp_kernel, bpp=bpp),
        out_shape=(
            jax.ShapeDtypeStruct((2, R, _LANE), jnp.float32),   # res (yl / yd)
            jax.ShapeDtypeStruct((2, R, _LANE), jnp.float32),   # z   (zl / zd)
        ),
        grid=grid,
        in_specs=[
            pl.BlockSpec((bpp, R, _LANE), per_branch),      # Y  per branch
            pl.BlockSpec((bpp, R, R), per_branch),          # G  per branch
            pl.BlockSpec((bpp, _LANE, _LANE), per_branch),  # W1 per branch
            pl.BlockSpec((bpp, _LANE, _LANE), per_branch),  # W2 per branch
        ],
        out_specs=(
            pl.BlockSpec((bpp, R, _LANE), per_branch),      # res per branch
            pl.BlockSpec((bpp, R, _LANE), per_branch),      # z   per branch
        ),
        compiler_params=pltpu.CompilerParams(
            dimension_semantics=("parallel",)),             # 1 branch / TC on v7x
        cost_estimate=pl.CostEstimate(
            flops=flops, transcendentals=0, bytes_accessed=bytes_accessed),
    )(y_st, g_st, w1_st, w2_st)

    yl = res[0, :n_m, :n_d]
    zl = z[0, :n_m, :hidden]
    yd = res[1, :n_d, :n_m]
    zd = z[1, :n_d, :hidden]
    return yl, zl, yd, zd


# ------------------------------ GNNp params --------------------------------
def init_gnnp_params(key, hidden, n_m, n_d):
    """Shapes follow GNNp.__init__:
       gnnpl = LP(hidden, mdi.shape[1])  -> acts on (gm, y0),   features = n_d
       gnnpd = LP(hidden, mdi.shape[0])  -> acts on (gd, y0.T), features = n_m
    """
    k1, k2, k3, k4 = jax.random.split(key, 4)

    def uinit(k, shape):
        lim = 1.0 / jnp.sqrt(jnp.float32(shape[1]))
        return jax.random.uniform(k, shape, jnp.float32, -lim, lim)

    return {
        "pl_w1": uinit(k1, (n_d, hidden)),
        "pl_w2": uinit(k2, (hidden, n_d)),
        "pd_w1": uinit(k3, (n_m, hidden)),
        "pd_w2": uinit(k4, (hidden, n_m)),
    }


# ------------------------------ references ---------------------------------
def gnnp_reference_f32(params, gm, gd, y0):
    """Pure-f32 module math."""
    def lp(g, y, w1, w2):
        z = jnp.maximum(g @ (y @ w1), 0.0)
        return g @ (z @ w2), z
    yl, zl = lp(gm, y0, params["pl_w1"], params["pl_w2"])
    yd, zd = lp(gd, y0.T, params["pd_w1"], params["pd_w2"])
    return yl, zl, yd, zd


def gnnp_reference_bf16(params, gm, gd, y0):
    """Mirrors the kernel's bf16-operand / f32-accumulate precision."""
    bf = jnp.bfloat16

    def lp(g, y, w1, w2):
        g = g.astype(bf)
        h = jnp.dot(y.astype(bf), w1.astype(bf),
                    preferred_element_type=jnp.float32).astype(bf)
        z = jnp.maximum(jnp.dot(g, h, preferred_element_type=jnp.float32), 0.0)
        r = jnp.dot(z.astype(bf), w2.astype(bf),
                    preferred_element_type=jnp.float32).astype(bf)
        return jnp.dot(g, r, preferred_element_type=jnp.float32), z

    yl, zl = lp(gm, y0, params["pl_w1"], params["pl_w2"])
    yd, zd = lp(gd, y0.T, params["pd_w1"], params["pd_w2"])
    return yl, zl, yd, zd


# --------------------------------- main ------------------------------------
if __name__ == "__main__":
    n_m, n_d, hidden = 16, 8, 32          # miRNAs, diseases, args.hidden

    key = jax.random.PRNGKey(0)
    kgm, kgd, ky0, kp = jax.random.split(key, 4)

    # synthetic graphs / labels (stand-ins for gm, gd, m-d.txt)
    gm = jax.random.uniform(kgm, (n_m, n_m), jnp.float32)
    gm = 0.5 * (gm + gm.T)                 # symmetric similarity graph
    gd = jax.random.uniform(kgd, (n_d, n_d), jnp.float32)
    gd = 0.5 * (gd + gd.T)
    y0 = jax.random.uniform(ky0, (n_m, n_d), jnp.float32)

    params = init_gnnp_params(kp, hidden, n_m, n_d)

    # pad / stack the static per-branch operands once (not per forward call)
    g_st, w1_st, w2_st = gnnp_prepare(params, gm, gd)

    yl, zl, yd, zd = jax.block_until_ready(
        gnnp_forward(g_st, w1_st, w2_st, y0, hidden=hidden))

    # shape checks (must match the PyTorch module's outputs)
    assert yl.shape == (n_m, n_d) and zl.shape == (n_m, hidden)
    assert yd.shape == (n_d, n_m) and zd.shape == (n_d, hidden)

    # tight check vs a reference with the same bf16-operand precision ...
    ref_bf = gnnp_reference_bf16(params, gm, gd, y0)
    for got, want in zip((yl, zl, yd, zd), ref_bf):
        assert jnp.allclose(got, want, atol=2e-3, rtol=2e-3), "bf16 reference mismatch"

    # ... and a loose sanity check vs the pure-f32 module math
    ref_f32 = gnnp_reference_f32(params, gm, gd, y0)
    for got, want in zip((yl, zl, yd, zd), ref_f32):
        assert jnp.allclose(got, want, atol=0.5, rtol=0.1), "f32 reference mismatch"

    print("KERNEL_OK")
</pallas_src>

<mosaic_0001>
module attributes {stable_mosaic.version = 11 : i64} {
  func.func @_gnnp_kernel(%arg0: i32, %arg1: memref<2x16x128xbf16, #tpu.memory_space<vmem>>, %arg2: memref<2x16x16xbf16, #tpu.memory_space<vmem>>, %arg3: memref<2x128x128xbf16, #tpu.memory_space<vmem>>, %arg4: memref<2x128x128xbf16, #tpu.memory_space<vmem>>, %arg5: memref<2x16x128xf32, #tpu.memory_space<vmem>>, %arg6: memref<2x16x128xf32, #tpu.memory_space<vmem>>) attributes {dimension_semantics = [#tpu.dimension_semantics<parallel>], iteration_bounds = array<i64: 1>, scalar_prefetch = 0 : i64, scratch_operands = 0 : i64, tpu.core_type = #tpu.core_type<tc>, window_params = [{transform_indices = @transform_0, window_bounds = array<i64: 2, 16, 128>}, {transform_indices = @transform_1, window_bounds = array<i64: 2, 16, 16>}, {transform_indices = @transform_2, window_bounds = array<i64: 2, 128, 128>}, {transform_indices = @transform_3, window_bounds = array<i64: 2, 128, 128>}, {transform_indices = @transform_4, window_bounds = array<i64: 2, 16, 128>}, {transform_indices = @transform_5, window_bounds = array<i64: 2, 16, 128>}]} {
    %c0 = arith.constant 0 : index
    %c0_0 = arith.constant 0 : index
    %c0_1 = arith.constant 0 : index
    %0 = vector.load %arg1[%c0, %c0_0, %c0_1] : memref<2x16x128xbf16, #tpu.memory_space<vmem>>, vector<1x16x128xbf16>
    %1 = vector.shape_cast %0 : vector<1x16x128xbf16> to vector<16x128xbf16>
    %c0_2 = arith.constant 0 : index
    %c0_3 = arith.constant 0 : index
    %c0_4 = arith.constant 0 : index
    %2 = vector.load %arg2[%c0_2, %c0_3, %c0_4] : memref<2x16x16xbf16, #tpu.memory_space<vmem>>, vector<1x16x16xbf16>
    %3 = vector.shape_cast %2 : vector<1x16x16xbf16> to vector<16x16xbf16>
    %c0_5 = arith.constant 0 : index
    %c0_6 = arith.constant 0 : index
    %c0_7 = arith.constant 0 : index
    %4 = vector.load %arg3[%c0_5, %c0_6, %c0_7] : memref<2x128x128xbf16, #tpu.memory_space<vmem>>, vector<1x128x128xbf16>
    %5 = vector.shape_cast %4 : vector<1x128x128xbf16> to vector<128x128xbf16>
    %c0_8 = arith.constant 0 : index
    %c0_9 = arith.constant 0 : index
    %c0_10 = arith.constant 0 : index
    %6 = vector.load %arg4[%c0_8, %c0_9, %c0_10] : memref<2x128x128xbf16, #tpu.memory_space<vmem>>, vector<1x128x128xbf16>
    %7 = vector.shape_cast %6 : vector<1x128x128xbf16> to vector<128x128xbf16>
    %cst = arith.constant dense<0.000000e+00> : vector<16x128xf32>
    %8 = tpu.matmul %1, %5, %cst {dimension_numbers = #tpu.dot_dimension_numbers<[1], [0], [0], [1], [0, 0, 1, 1], [], []>} : vector<16x128xbf16>, vector<128x128xbf16>, vector<16x128xf32> -> vector<16x128xf32>
    %9 = arith.truncf %8 : vector<16x128xf32> to vector<16x128xbf16>
    %cst_11 = arith.constant dense<0.000000e+00> : vector<16x128xf32>
    %10 = tpu.matmul %3, %9, %cst_11 {dimension_numbers = #tpu.dot_dimension_numbers<[1], [0], [0], [1], [0, 0, 1, 1], [], []>} : vector<16x16xbf16>, vector<16x128xbf16>, vector<16x128xf32> -> vector<16x128xf32>
    %cst_12 = arith.constant 0.000000e+00 : f32
    %11 = vector.broadcast %cst_12 : f32 to vector<16x128xf32>
    %12 = arith.maximumf %10, %11 : vector<16x128xf32>
    %c0_13 = arith.constant 0 : index
    %c0_14 = arith.constant 0 : index
    %c0_15 = arith.constant 0 : index
    %13 = vector.load %arg6[%c0_13, %c0_14, %c0_15] : memref<2x16x128xf32, #tpu.memory_space<vmem>>, vector<1x16x128xf32>
    %14 = vector.shape_cast %13 : vector<1x16x128xf32> to vector<16x128xf32>
    %15 = vector.shape_cast %12 : vector<16x128xf32> to vector<1x16x128xf32>
    tpu.vector_store %arg6[%c0_13, %c0_14, %c0_15], %15 {strides = array<i32>} : memref<2x16x128xf32, #tpu.memory_space<vmem>>, vector<1x16x128xf32>,
    %16 = arith.truncf %12 : vector<16x128xf32> to vector<16x128xbf16>
    %cst_16 = arith.constant dense<0.000000e+00> : vector<16x128xf32>
    %17 = tpu.matmul %16, %7, %cst_16 {dimension_numbers = #tpu.dot_dimension_numbers<[1], [0], [0], [1], [0, 0, 1, 1], [], []>} : vector<16x128xbf16>, vector<128x128xbf16>, vector<16x128xf32> -> vector<16x128xf32>
    %18 = arith.truncf %17 : vector<16x128xf32> to vector<16x128xbf16>
    %cst_17 = arith.constant dense<0.000000e+00> : vector<16x128xf32>
    %19 = tpu.matmul %3, %18, %cst_17 {dimension_numbers = #tpu.dot_dimension_numbers<[1], [0], [0], [1], [0, 0, 1, 1], [], []>} : vector<16x16xbf16>, vector<16x128xbf16>, vector<16x128xf32> -> vector<16x128xf32>
    %c0_18 = arith.constant 0 : index
    %c0_19 = arith.constant 0 : index
    %c0_20 = arith.constant 0 : index
    %20 = vector.load %arg5[%c0_18, %c0_19, %c0_20] : memref<2x16x128xf32, #tpu.memory_space<vmem>>, vector<1x16x128xf32>
    %21 = vector.shape_cast %20 : vector<1x16x128xf32> to vector<16x128xf32>
    %22 = vector.shape_cast %19 : vector<16x128xf32> to vector<1x16x128xf32>
    tpu.vector_store %arg5[%c0_18, %c0_19, %c0_20], %22 {strides = array<i32>} : memref<2x16x128xf32, #tpu.memory_space<vmem>>, vector<1x16x128xf32>,
    %c1 = arith.constant 1 : index
    %c0_21 = arith.constant 0 : index
    %c0_22 = arith.constant 0 : index
    %23 = vector.load %arg1[%c1, %c0_21, %c0_22] : memref<2x16x128xbf16, #tpu.memory_space<vmem>>, vector<1x16x128xbf16>
    %24 = vector.shape_cast %23 : vector<1x16x128xbf16> to vector<16x128xbf16>
    %c1_23 = arith.constant 1 : index
    %c0_24 = arith.constant 0 : index
    %c0_25 = arith.constant 0 : index
    %25 = vector.load %arg2[%c1_23, %c0_24, %c0_25] : memref<2x16x16xbf16, #tpu.memory_space<vmem>>, vector<1x16x16xbf16>
    %26 = vector.shape_cast %25 : vector<1x16x16xbf16> to vector<16x16xbf16>
    %c1_26 = arith.constant 1 : index
    %c0_27 = arith.constant 0 : index
    %c0_28 = arith.constant 0 : index
    %27 = vector.load %arg3[%c1_26, %c0_27, %c0_28] : memref<2x128x128xbf16, #tpu.memory_space<vmem>>, vector<1x128x128xbf16>
    %28 = vector.shape_cast %27 : vector<1x128x128xbf16> to vector<128x128xbf16>
    %c1_29 = arith.constant 1 : index
    %c0_30 = arith.constant 0 : index
    %c0_31 = arith.constant 0 : index
    %29 = vector.load %arg4[%c1_29, %c0_30, %c0_31] : memref<2x128x128xbf16, #tpu.memory_space<vmem>>, vector<1x128x128xbf16>
    %30 = vector.shape_cast %29 : vector<1x128x128xbf16> to vector<128x128xbf16>
    %cst_32 = arith.constant dense<0.000000e+00> : vector<16x128xf32>
    %31 = tpu.matmul %24, %28, %cst_32 {dimension_numbers = #tpu.dot_dimension_numbers<[1], [0], [0], [1], [0, 0, 1, 1], [], []>} : vector<16x128xbf16>, vector<128x128xbf16>, vector<16x128xf32> -> vector<16x128xf32>
    %32 = arith.truncf %31 : vector<16x128xf32> to vector<16x128xbf16>
    %cst_33 = arith.constant dense<0.000000e+00> : vector<16x128xf32>
    %33 = tpu.matmul %26, %32, %cst_33 {dimension_numbers = #tpu.dot_dimension_numbers<[1], [0], [0], [1], [0, 0, 1, 1], [], []>} : vector<16x16xbf16>, vector<16x128xbf16>, vector<16x128xf32> -> vector<16x128xf32>
    %cst_34 = arith.constant 0.000000e+00 : f32
    %34 = vector.broadcast %cst_34 : f32 to vector<16x128xf32>
    %35 = arith.maximumf %33, %34 : vector<16x128xf32>
    %c1_35 = arith.constant 1 : index
    %c0_36 = arith.constant 0 : index
    %c0_37 = arith.constant 0 : index
    %36 = vector.load %arg6[%c1_35, %c0_36, %c0_37] : memref<2x16x128xf32, #tpu.memory_space<vmem>>, vector<1x16x128xf32>
    %37 = vector.shape_cast %36 : vector<1x16x128xf32> to vector<16x128xf32>
    %38 = vector.shape_cast %35 : vector<16x128xf32> to vector<1x16x128xf32>
    tpu.vector_store %arg6[%c1_35, %c0_36, %c0_37], %38 {strides = array<i32>} : memref<2x16x128xf32, #tpu.memory_space<vmem>>, vector<1x16x128xf32>,
    %39 = arith.truncf %35 : vector<16x128xf32> to vector<16x128xbf16>
    %cst_38 = arith.constant dense<0.000000e+00> : vector<16x128xf32>
    %40 = tpu.matmul %39, %30, %cst_38 {dimension_numbers = #tpu.dot_dimension_numbers<[1], [0], [0], [1], [0, 0, 1, 1], [], []>} : vector<16x128xbf16>, vector<128x128xbf16>, vector<16x128xf32> -> vector<16x128xf32>
    %41 = arith.truncf %40 : vector<16x128xf32> to vector<16x128xbf16>
    %cst_39 = arith.constant dense<0.000000e+00> : vector<16x128xf32>
    %42 = tpu.matmul %26, %41, %cst_39 {dimension_numbers = #tpu.dot_dimension_numbers<[1], [0], [0], [1], [0, 0, 1, 1], [], []>} : vector<16x16xbf16>, vector<16x128xbf16>, vector<16x128xf32> -> vector<16x128xf32>
    %c1_40 = arith.constant 1 : index
    %c0_41 = arith.constant 0 : index
    %c0_42 = arith.constant 0 : index
    %43 = vector.load %arg5[%c1_40, %c0_41, %c0_42] : memref<2x16x128xf32, #tpu.memory_space<vmem>>, vector<1x16x128xf32>
    %44 = vector.shape_cast %43 : vector<1x16x128xf32> to vector<16x128xf32>
    %45 = vector.shape_cast %42 : vector<16x128xf32> to vector<1x16x128xf32>
    tpu.vector_store %arg5[%c1_40, %c0_41, %c0_42], %45 {strides = array<i32>} : memref<2x16x128xf32, #tpu.memory_space<vmem>>, vector<1x16x128xf32>,
    return
  }
  func.func @transform_0(%arg0: i32) -> (i32, i32, i32) {
    %c0_i32 = arith.constant 0 : i32
    %c0_i32_0 = arith.constant 0 : i32
    %c0_i32_1 = arith.constant 0 : i32
    return %arg0, %c0_i32, %c0_i32_0 : i32, i32, i32
  }
  func.func @transform_1(%arg0: i32) -> (i32, i32, i32) {
    %c0_i32 = arith.constant 0 : i32
    %c0_i32_0 = arith.constant 0 : i32
    %c0_i32_1 = arith.constant 0 : i32
    return %arg0, %c0_i32, %c0_i32_0 : i32, i32, i32
  }
  func.func @transform_2(%arg0: i32) -> (i32, i32, i32) {
    %c0_i32 = arith.constant 0 : i32
    %c0_i32_0 = arith.constant 0 : i32
    %c0_i32_1 = arith.constant 0 : i32
    return %arg0, %c0_i32, %c0_i32_0 : i32, i32, i32
  }
  func.func @transform_3(%arg0: i32) -> (i32, i32, i32) {
    %c0_i32 = arith.constant 0 : i32
    %c0_i32_0 = arith.constant 0 : i32
    %c0_i32_1 = arith.constant 0 : i32
    return %arg0, %c0_i32, %c0_i32_0 : i32, i32, i32
  }
  func.func @transform_4(%arg0: i32) -> (i32, i32, i32) {
    %c0_i32 = arith.constant 0 : i32
    %c0_i32_0 = arith.constant 0 : i32
    %c0_i32_1 = arith.constant 0 : i32
    return %arg0, %c0_i32, %c0_i32_0 : i32, i32, i32
  }
  func.func @transform_5(%arg0: i32) -> (i32, i32, i32) {
    %c0_i32 = arith.constant 0 : i32
    %c0_i32_0 = arith.constant 0 : i32
    %c0_i32_1 = arith.constant 0 : i32
    return %arg0, %c0_i32, %c0_i32_0 : i32, i32, i32
  }
}

</mosaic_0001>

<bundles_post_ra>
// kernel: gnnp_forward.1
= control target key start
LH: loop header
LB: loop body
LE: loop exit
PB: predicated region body
PF: predicated region fallthrough
CT: control target
= control target key end

     0   :  { %11 = vsyncpa [#allocation3], 0  ;;  %s711_s21 = smov [#allocation2]   ;;  %s712_s23 = smov 64   ;;  %s839_s0 = inlined_call_operand.vmem [shape: bf16[2,16,128], index: 0, kind: input, shape index: {}]   ;;  %s840_s1 = inlined_call_operand.vmem [shape: bf16[2,16,16], index: 1, kind: input, shape index: {}]   ;;  %s841_s2 = inlined_call_operand.vmem [shape: bf16[2,128,128], index: 2, kind: input, shape index: {}]   ;;  %s842_s3 = inlined_call_operand.hbm [shape: bf16[2,128,128], index: 3, kind: input, shape index: {}]   ;;  %s843_s4 = inlined_call_operand.vmem [shape: f32[2,16,128], index: 4, kind: output, shape index: {0}]   ;;  %s844_s5 = inlined_call_operand.vmem [shape: f32[2,16,128], index: 5, kind: output, shape index: {1}]  }
   0x1   :  { %s22_s20 = sshll.u32 %s842_s3, 4  ;;  %s24_s22 = sshll.u32 %s711_s21, 4  ;;  %s23_s20 = int_to_ptr.hbm [resolvable:$true] %s22_s20  ;;  %s25_s22 = int_to_ptr.vmem [resolvable:$true] %s24_s22 }
   0x2   :  { %s713_s24 = smov 4  }
   0x3   :  { %30 = dma.hbm_to_vmem [thread:$0]  %s23_s20, 2048, %s25_s22, [#allocation3], %s712_s23, %s712_s23, %s713_s24  }
   0x4   :  { %709 = dma.done.wait [#allocation3], 2048  }
   0x5   :  { %710 = vsyncadd [#allocation3], 4294965248  ;;  %v655_v0 = vld [vmem:[%s841_s2 + $0x38] sm:$0xff]  ;;  %v654_v1 = vld [vmem:[%s841_s2 + $0x30] sm:$0xff]  ;;  %vm146_vm0 = vcmask 130048  }
   0x6   :  { %126 = vmatpush.bf16.msra.mxu0 %v655_v0  ;;  %v653_v2 = vld [vmem:[%s841_s2 + $0x28] sm:$0xff]  ;;  %v652_v3 = vld [vmem:[%s841_s2 + $0x20] sm:$0xff]  ;;  %v651_v4 = vld [vmem:[%s841_s2 + $0x18] sm:$0xff] }
   0x7   :  { %v650_v5 = vld [vmem:[%s841_s2 + $0x10] sm:$0xff]  ;;  %v649_v6 = vld [vmem:[%s841_s2 + $0x8] sm:$0xff]  ;;  %v648_v7 = vld [vmem:[%s841_s2] sm:$0xff] }
   0x8   :  { %v646_v8 = vld [vmem:[%s839_s0] sm:$0xff]  ;;  %v673_v11 = vld [vmem:[%s841_s2 + $0x78] sm:$0xff]  ;;  %v672_v15 = vld [vmem:[%s841_s2 + $0x70] sm:$0xff] }
   0x9   :  { %v780_v13 = vld [vmem:[%s840_s1] sm:$0xff]  ;;  %v663_v14 = vld [vmem:[#allocation2 + $0x38] sm:$0xff]  ;;  %v662_v16 = vld [vmem:[#allocation2 + $0x30] sm:$0xff] }
   0xa   :  { %127 = vmatpush.bf16.msra.mxu0 %v654_v1  ;;  %217 = vmatpush.bf16.msra.mxu2 %v663_v14  ;;  %v671_v17 = vld [vmem:[%s841_s2 + $0x68] sm:$0xff]  ;;  %v670_v19 = vld [vmem:[%s841_s2 + $0x60] sm:$0xff]  ;;  %v669_v21 = vld [vmem:[%s841_s2 + $0x58] sm:$0xff] }
   0xb   :  { %v661_v18 = vld [vmem:[#allocation2 + $0x28] sm:$0xff]  ;;  %v660_v20 = vld [vmem:[#allocation2 + $0x20] sm:$0xff]  ;;  %v659_v22 = vld [vmem:[#allocation2 + $0x18] sm:$0xff] }
   0xc   :  { %v668_v23 = vld [vmem:[%s841_s2 + $0x50] sm:$0xff]  ;;  %v667_v24 = vld [vmem:[%s841_s2 + $0x48] sm:$0xff]  ;;  %v666_v25 = vld [vmem:[%s841_s2 + $0x40] sm:$0xff] }
   0xd   :  { %v664_v26 = vld [vmem:[%s839_s0 + $0x8] sm:$0xff]  ;;  %v658_v27 = vld [vmem:[#allocation2 + $0x10] sm:$0xff]  ;;  %v656_v29 = vld [vmem:[#allocation2] sm:$0xff] }
   0xe   :  { %128 = vmatpush.bf16.msra.mxu0 %v653_v2  ;;  %218 = vmatpush.bf16.msra.mxu2 %v662_v16  ;;  %v657_v28 = vld [vmem:[#allocation2 + $0x8] sm:$0xff]  ;;  %v681_v39 = vld [vmem:[#allocation2 + $0x78] sm:$0xff]  ;;  %v680_v40 = vld [vmem:[#allocation2 + $0x70] sm:$0xff] }
   0xf   :  { %v665_v38 = vld [vmem:[%s840_s1 + $0x8] sm:$0xff]  ;;  %v678_v42 = vld [vmem:[#allocation2 + $0x60] sm:$0xff]  ;;  %v677_v43 = vld [vmem:[#allocation2 + $0x58] sm:$0xff] }
  0x10   :  { %v679_v41 = vld [vmem:[#allocation2 + $0x68] sm:$0xff]  ;;  %v676_v44 = vld [vmem:[#allocation2 + $0x50] sm:$0xff]  ;;  %v674_v47 = vld [vmem:[#allocation2 + $0x40] sm:$0xff] }
  0x11   :  { %v675_v46 = vld [vmem:[#allocation2 + $0x48] sm:$0xff] }
  0x12   :  { %129 = vmatpush.bf16.msra.mxu0 %v652_v3  ;;  %219 = vmatpush.bf16.msra.mxu2 %v661_v18 }
  0x16   :  { %130 = vmatpush.bf16.msra.mxu0 %v651_v4  ;;  %220 = vmatpush.bf16.msra.mxu2 %v660_v20 }
  0x1a   :  { %131 = vmatpush.bf16.msra.mxu0 %v650_v5  ;;  %221 = vmatpush.bf16.msra.mxu2 %v659_v22 }
  0x1e   :  { %132 = vmatpush.bf16.msra.mxu0 %v649_v6  ;;  %222 = vmatpush.bf16.msra.mxu2 %v658_v27 }
  0x22   :  { %133 = vmatpush.bf16.msra.mxu0 %v648_v7  ;;  %223 = vmatpush.bf16.msra.mxu2 %v657_v28 }
  0x25   :  { %134 = vmatmul.bf16.vlgmr.msra.gmra.mxu0 %v646_v8 }
  0x26   :  { %224 = vmatpush.bf16.msra.mxu2 %v656_v29 }
  0xa2   :  { %v135_v9 = vpop.f32.mrf.mxu0 }
  0xaa   :  { %v137_v10 = vpop.f32.mrf.mxu0 }
  0xab   :  { %v140_v12 = vpack.c.bf16 %v137_v10, %v135_v9 }
  0xad   :  { %157 = vmatpush.bf16.msra.mxu1 %v140_v12 }
  0xb0   :  { %514 = vmatmul.msk.bf16.vlgmr.msra.gmra.mxu1 %vm146_vm0, %v780_v13 }
  0xb1   :  { %342 = vmatpush.bf16.msrb.mxu1 %v673_v11 }
  0xb5   :  { %343 = vmatpush.bf16.msrb.mxu1 %v672_v15 }
  0xb9   :  { %344 = vmatpush.bf16.msrb.mxu1 %v671_v17 }
  0xbd   :  { %345 = vmatpush.bf16.msrb.mxu1 %v670_v19 }
  0xc1   :  { %346 = vmatpush.bf16.msrb.mxu1 %v669_v21 }
  0xc5   :  { %347 = vmatpush.bf16.msrb.mxu1 %v668_v23 }
  0xc9   :  { %348 = vmatpush.bf16.msrb.mxu1 %v667_v24 }
  0xcd   :  { %349 = vmatpush.bf16.msrb.mxu1 %v666_v25 }
  0xd0   :  { %350 = vmatmul.bf16.vlgmr.msrb.gmra.mxu1 %v664_v26 }
 0x12d   :  { %v159_v30 = vpop.f32.mrf.mxu1 }
 0x12e   :  { %v164_v31 = vmax.f32 %v159_v30, 0.0 }
 0x130   :  { %166 = vst [vmem:[%s844_s5] sm:$0xff] %v164_v31 }
 0x135   :  { %v161_v32 = vpop.f32.mrf.mxu1 }
 0x136   :  { %v165_v33 = vmax.f32 %v161_v32, 0.0 }
 0x138   :  { %167 = vst [vmem:[%s844_s5 + $0x8] sm:$0xff] %v165_v33  ;;  %v168_v34 = vpack.c.bf16 %v165_v33, %v164_v31 }
 0x13a   :  { %225 = vmatmul.bf16.vlgmr.msra.gmra.mxu2 %v168_v34 }
 0x14d   :  { %v351_v35 = vpop.f32.mrf.mxu1 }
 0x155   :  { %v353_v36 = vpop.f32.mrf.mxu1 }
 0x156   :  { %v356_v37 = vpack.c.bf16 %v353_v36, %v351_v35 }
 0x158   :  { %372 = vmatpush.bf16.msra.mxu3 %v356_v37 }
 0x15b   :  { %608 = vmatmul.msk.bf16.vlgmr.msra.gmra.mxu3 %vm146_vm0, %v665_v38 }
 0x15c   :  { %433 = vmatpush.bf16.msrb.mxu3 %v681_v39 }
 0x160   :  { %434 = vmatpush.bf16.msrb.mxu3 %v680_v40 }
 0x164   :  { %435 = vmatpush.bf16.msrb.mxu3 %v679_v41 }
 0x168   :  { %436 = vmatpush.bf16.msrb.mxu3 %v678_v42 }
 0x16c   :  { %437 = vmatpush.bf16.msrb.mxu3 %v677_v43 }
 0x170   :  { %438 = vmatpush.bf16.msrb.mxu3 %v676_v44 }
 0x174   :  { %439 = vmatpush.bf16.msrb.mxu3 %v675_v46 }
 0x178   :  { %440 = vmatpush.bf16.msrb.mxu3 %v674_v47 }
 0x1bd   :  { %v226_v45 = vpop.f32.mrf.mxu2 }
 0x1c5   :  { %v228_v48 = vpop.f32.mrf.mxu2 }
 0x1c6   :  { %v231_v49 = vpack.c.bf16 %v228_v48, %v226_v45 }
 0x1c8   :  { %239 = vmatpush.bf16.msrb.mxu2 %v231_v49 }
 0x1cb   :  { %547 = vmatmul.msk.bf16.vlgmr.msrb.gmra.mxu2 %vm146_vm0, %v780_v13 }
 0x1de   :  { %v374_v50 = vpop.f32.mrf.mxu3 }
 0x1df   :  { %v379_v51 = vmax.f32 %v374_v50, 0.0 }
 0x1e1   :  { %609 = vst [vmem:[%s844_s5 + $0x10] sm:$0xff] %v379_v51 }
 0x1e6   :  { %v376_v52 = vpop.f32.mrf.mxu3 }
 0x1e7   :  { %v380_v53 = vmax.f32 %v376_v52, 0.0 }
 0x1e9   :  { %610 = vst [vmem:[%s844_s5 + $0x18] sm:$0xff] %v380_v53  ;;  %v384_v54 = vpack.c.bf16 %v380_v53, %v379_v51 }
 0x1eb   :  { %441 = vmatmul.bf16.vlgmr.msrb.gmra.mxu3 %v384_v54 }
 0x24e   :  { %v241_v55 = vpop.f32.mrf.mxu2 }
 0x24f   :  { %246 = vst [vmem:[%s843_s4] sm:$0xff] %v241_v55 }
 0x256   :  { %v243_v59 = vpop.f32.mrf.mxu2 }
 0x257   :  { %247 = vst [vmem:[%s843_s4 + $0x8] sm:$0xff] %v243_v59 }
 0x26e   :  { %v442_v56 = vpop.f32.mrf.mxu3 }
 0x276   :  { %v444_v57 = vpop.f32.mrf.mxu3 }
 0x277   :  { %v447_v58 = vpack.c.bf16 %v444_v57, %v442_v56 }
 0x279   :  { %455 = vmatpush.bf16.msrb.mxu0 %v447_v58 }
 0x27c   :  { %643 = vmatmul.msk.bf16.vlgmr.msrb.gmra.mxu0 %vm146_vm0, %v665_v38 }
 0x2f9   :  { %v457_v60 = vpop.f32.mrf.mxu0 }
 0x2fa   :  { %644 = vst [vmem:[%s843_s4 + $0x10] sm:$0xff] %v457_v60 }
 0x301   :  { %v459_v61 = vpop.f32.mrf.mxu0 }
 0x302   :  { %645 = vst [vmem:[%s843_s4 + $0x18] sm:$0xff] %v459_v61 }
 0x303   :  { %473 = vsyncpa [#allocation3], 1 }

</bundles_post_ra>
